<compile_context>
chip_gen: v6e
topology: v6e:2x2x1
jax: 0.10.0
libtpu: 0.0.40
codegen_flags: <defaults>
</compile_context>

<pallas_src>
import numpy as np

import jax
import jax.numpy as jnp
from jax.experimental import pallas as pl
from jax.experimental.pallas import tpu as pltpu


# ----------------------------------------------------------------------------
# Pallas kernel: fused 3x3 conv (one banded matmul) + bias + ReLU + avg-pool
# ----------------------------------------------------------------------------
def _conv_relu_pool_kernel(x_ref, w_ref, b_ref, pm_ref, h_ref, p_ref):
    # x_ref : (N*H, 3*(W+2)*Cin) bf16   K-fused conv rows (whole batch)
    # w_ref : (3*(W+2)*Cin, W*Cout) bf16  fused banded (Toeplitz) weight
    # b_ref : (1, W*Cout) f32             bias tiled along W
    # pm_ref: (W*Cout, Cout) bf16         0/1 pooling matrix (sums W positions)
    # h_ref : (N*H, W*Cout) f32           lane-dense conv+ReLU output
    # p_ref : (N, Cout) f32               fused global-average-pool output
    M, WC = h_ref.shape
    N, Cout = p_ref.shape
    H = M // N
    W = WC // Cout

    # Single bf16 MXU pass (M=32, K=216, N=128), f32 accumulation.
    acc = jnp.dot(x_ref[...], w_ref[...], preferred_element_type=jnp.float32)
    act = jnp.maximum(acc + b_ref[...], 0.0)          # f32 epilogue (v5e-safe)
    h_ref[...] = act.astype(h_ref.dtype)              # unmasked lane-dense store

    # Fused global-average-pool: sum over W via a 0/1 matmul (MXU), then an
    # XLU sublane reduce per image (H is a multiple of 8 -> aligned slices).
    psum = jnp.dot(act.astype(jnp.bfloat16), pm_ref[...],
                   preferred_element_type=jnp.float32)          # (N*H, Cout)
    inv = 1.0 / (H * W)
    for n in range(N):  # N=2, unrolled
        p_ref[n:n + 1, :] = (
            jnp.sum(psum[n * H:(n + 1) * H, :], axis=0, keepdims=True) * inv
        ).astype(p_ref.dtype)


# ----------------------------------------------------------------------------
# Pallas wrapper (single grid step: the whole batch is one block)
# ----------------------------------------------------------------------------
def conv3x3_relu_pool_pallas(lhs_rows, w_fused, bias_row, pool_mat, N):
    """lhs_rows: (N*H, 3*(W+2)*Cin) bf16 -> (h (N*H, W*Cout) f32, pooled (N, Cout) f32)."""
    M, Kf = lhs_rows.shape
    WC = w_fused.shape[1]
    Cout = pool_mat.shape[1]
    return pl.pallas_call(
        _conv_relu_pool_kernel,
        out_shape=(jax.ShapeDtypeStruct((M, WC), jnp.float32),
                   jax.ShapeDtypeStruct((N, Cout), jnp.float32)),
        grid_spec=pltpu.PrefetchScalarGridSpec(
            num_scalar_prefetch=0,
            grid=(1,),                                  # single step, N folded into M
            in_specs=[
                pl.BlockSpec((M, Kf), lambda i: (0, 0)),
                pl.BlockSpec((Kf, WC), lambda i: (0, 0)),
                pl.BlockSpec((1, WC), lambda i: (0, 0)),
                pl.BlockSpec((WC, Cout), lambda i: (0, 0)),
            ],
            out_specs=(
                pl.BlockSpec((M, WC), lambda i: (0, 0)),
                pl.BlockSpec((N, Cout), lambda i: (0, 0)),
            ),
        ),
        compiler_params=pltpu.CompilerParams(
            dimension_semantics=("arbitrary",)),
    )(lhs_rows, w_fused, bias_row, pool_mat)


# ----------------------------------------------------------------------------
# Jitted end-to-end paths (glue fused by XLA around the Pallas kernel)
# ----------------------------------------------------------------------------
@jax.jit
def _forward_impl(x_nchw, w_fused, bias_row, pool_mat):
    """NCHW f32 input -> (h NCHW f32, pooled (N, Cout) f32)."""
    N, Cin, H, W = x_nchw.shape
    Cout = pool_mat.shape[1]
    x_nhwc = jnp.transpose(x_nchw, (0, 2, 3, 1))
    xp = jnp.pad(x_nhwc, ((0, 0), (1, 1), (1, 1), (0, 0)))
    x_rows = xp.reshape(N, H + 2, (W + 2) * Cin).astype(jnp.bfloat16)
    # K-fused lhs: row m = n*H + h holds the three padded input rows h, h+1, h+2
    # back-to-back, matching the fused banded weight's K ordering. Fused by XLA
    # with the transpose/pad above (single glue pass, bf16 bytes).
    lhs = jnp.concatenate([x_rows[:, dy:dy + H, :] for dy in range(3)],
                          axis=-1).reshape(N * H, 3 * (W + 2) * Cin)
    h_rows, pooled = conv3x3_relu_pool_pallas(lhs, w_fused, bias_row, pool_mat, N)
    # NCHW is materialized only because forward() must return it.
    h = jnp.transpose(h_rows.reshape(N, H, W, Cout), (0, 3, 1, 2))
    return h, pooled


@jax.jit
def _decoder_mse(pooled, dec_w, dec_b, y):
    # Tiny decoder + MSE in plain jnp: XLA fuses it; a pallas_call launch would
    # cost more than the ~1e3 FLOPs of math.
    out = pooled @ dec_w.T + dec_b
    d = out - y
    return jnp.mean(d * d)


# ----------------------------------------------------------------------------
# Host-side parameter repacking (done once per weight, outside the hot path)
# ----------------------------------------------------------------------------
def _build_banded_weight(enc_w, W):
    """enc_w (Cout, Cin, 3, 3) PyTorch layout -> (3*(W+2)*Cin, W*Cout) fused band.

    band[dy*(W+2)*Cin + wx*Cin + ci, w*Cout + co] = enc_w[co, ci, dy, wx - w]
    for 0 <= wx - w < 3, so a single matmul against the K-fused input rows
    applies all 9 taps of the SAME-padded 3x3 conv.
    """
    Cout, Cin, Kh, Kw = enc_w.shape
    Wp = W + 2
    w_np = np.asarray(enc_w, np.float32)
    band = np.zeros((Kh, Wp, Cin, W, Cout), np.float32)
    for dy in range(Kh):
        for dx in range(Kw):
            tap = w_np[:, :, dy, dx].T          # (Cin, Cout)
            for w in range(W):
                band[dy, w + dx, :, w, :] = tap
    return band.reshape(Kh * Wp * Cin, W * Cout)


# ----------------------------------------------------------------------------
# LocalLossBlock mirror
# ----------------------------------------------------------------------------
class LocalLossBlockPallas:
    """Mirror of the PyTorch LocalLossBlock with a Pallas-backed encoder."""

    def __init__(self, enc_w, enc_b, dec_w, dec_b, name="block"):
        self.enc_w = enc_w      # (Cout, Cin, 3, 3)  -- PyTorch conv layout
        self.enc_b = enc_b      # (Cout,)
        self.dec_w = dec_w      # (num_classes, Cout) -- PyTorch Linear layout
        self.dec_b = dec_b      # (num_classes,)
        self.name = name
        self.act = None
        self._pooled = None     # fused avg-pool output, saved alongside act
        self.loss = None
        self._cache = {}        # per-W cached fused band / bias row / pool matrix

    def _prepared(self, W):
        if W not in self._cache:
            Cout = self.enc_w.shape[0]
            band = jnp.asarray(_build_banded_weight(self.enc_w, W), jnp.bfloat16)
            brow = jnp.asarray(
                np.tile(np.asarray(self.enc_b, np.float32), W))[None, :]
            pmat = jnp.asarray(
                np.tile(np.eye(Cout, dtype=np.float32), (W, 1)), jnp.bfloat16)
            self._cache[W] = (band, brow, pmat)
        return self._cache[W]

    def forward(self, x_nchw, save_act=True):
        W = x_nchw.shape[3]
        band, brow, pmat = self._prepared(W)
        h, pooled = _forward_impl(x_nchw, band, brow, pmat)
        if save_act:
            self.act = h
            self._pooled = pooled
        return h

    def get_loss(self, y, weights=None, categorical=False, scale=1.0):
        # TODO(synk): `weights`/`categorical`/`scale != 1.0` decoder variants are
        # abstract in the reference module and not instantiated here.
        assert weights is None and scale == 1.0
        if self._pooled is None:
            raise ValueError("get_loss() requires a prior forward(..., save_act=True)")
        self.loss = _decoder_mse(self._pooled, self.dec_w, self.dec_b, y)
        self.act = None
        self._pooled = None
        return self.loss


# ----------------------------------------------------------------------------
# Demo / correctness check
# ----------------------------------------------------------------------------
if __name__ == "__main__":
    key = jax.random.PRNGKey(0)
    k1, k2, k3, k4, k5, k6 = jax.random.split(key, 6)

    N, Cin, H, W = 2, 4, 16, 16
    Cout, num_classes = 8, 10          # W * Cout = 128 -> lane-dense output slab

    x = jax.random.normal(k1, (N, Cin, H, W), jnp.float32)          # NCHW input
    enc_w = jax.random.normal(k2, (Cout, Cin, 3, 3), jnp.float32) * 0.1
    enc_b = jax.random.normal(k3, (Cout,), jnp.float32) * 0.1
    dec_w = jax.random.normal(k4, (num_classes, Cout), jnp.float32) * 0.1
    dec_b = jax.random.normal(k5, (num_classes,), jnp.float32) * 0.1
    y = jax.random.normal(k6, (N, num_classes), jnp.float32)

    block = LocalLossBlockPallas(enc_w, enc_b, dec_w, dec_b)

    h = block.forward(x, save_act=True)
    h = jax.block_until_ready(h)
    assert h.shape == (N, Cout, H, W)

    # Reference encoder (full-precision XLA conv) to validate the Pallas kernel.
    # The kernel uses bf16 MXU operands with f32 accumulation, hence 2e-2 tol.
    x_nhwc = jnp.transpose(x, (0, 2, 3, 1))
    w_hwio = jnp.transpose(enc_w, (2, 3, 1, 0))
    ref = jax.lax.conv_general_dilated(
        x_nhwc, w_hwio, (1, 1), "SAME",
        dimension_numbers=("NHWC", "HWIO", "NHWC"),
        precision=jax.lax.Precision.HIGHEST) + enc_b
    ref = jnp.maximum(ref, 0.0)
    ref = jnp.transpose(ref, (0, 3, 1, 2))
    assert jnp.allclose(h, ref, atol=2e-2, rtol=2e-2), "encoder mismatch"

    # Decoder + MSE loss path (block.get_loss), validated against plain JAX.
    pooled_ref = jnp.mean(h, axis=(2, 3))
    loss_ref = jnp.mean((pooled_ref @ dec_w.T + dec_b - y) ** 2)
    loss = jax.block_until_ready(block.get_loss(y))
    assert jnp.allclose(loss, loss_ref, atol=1e-2, rtol=1e-2), "loss mismatch"
    assert block.act is None

    print("KERNEL_OK")
</pallas_src>

<mosaic_0001>
module attributes {stable_mosaic.version = 11 : i64} {
  func.func @_conv_relu_pool_kernel(%arg0: i32, %arg1: memref<32x216xbf16, #tpu.memory_space<vmem>>, %arg2: memref<216x128xbf16, #tpu.memory_space<vmem>>, %arg3: memref<1x128xf32, #tpu.memory_space<vmem>>, %arg4: memref<128x8xbf16, #tpu.memory_space<vmem>>, %arg5: memref<32x128xf32, #tpu.memory_space<vmem>>, %arg6: memref<2x8xf32, #tpu.memory_space<vmem>>) attributes {dimension_semantics = [#tpu.dimension_semantics<arbitrary>], iteration_bounds = array<i64: 1>, scalar_prefetch = 0 : i64, scratch_operands = 0 : i64, tpu.core_type = #tpu.core_type<tc>, window_params = [{pipeline_mode = #tpu.pipeline_mode<synchronous>, transform_indices = @transform_0, window_bounds = array<i64: 32, 216>}, {pipeline_mode = #tpu.pipeline_mode<synchronous>, transform_indices = @transform_1, window_bounds = array<i64: 216, 128>}, {pipeline_mode = #tpu.pipeline_mode<synchronous>, transform_indices = @transform_2, window_bounds = array<i64: 1, 128>}, {pipeline_mode = #tpu.pipeline_mode<synchronous>, transform_indices = @transform_3, window_bounds = array<i64: 128, 8>}, {pipeline_mode = #tpu.pipeline_mode<synchronous>, transform_indices = @transform_4, window_bounds = array<i64: 32, 128>}, {pipeline_mode = #tpu.pipeline_mode<synchronous>, transform_indices = @transform_5, window_bounds = array<i64: 2, 8>}]} {
    %c0 = arith.constant 0 : index
    %c0_0 = arith.constant 0 : index
    %0 = vector.load %arg1[%c0, %c0_0] : memref<32x216xbf16, #tpu.memory_space<vmem>>, vector<32x216xbf16>
    %c0_1 = arith.constant 0 : index
    %c0_2 = arith.constant 0 : index
    %1 = vector.load %arg2[%c0_1, %c0_2] : memref<216x128xbf16, #tpu.memory_space<vmem>>, vector<216x128xbf16>
    %cst = arith.constant dense<0.000000e+00> : vector<32x128xf32>
    %2 = tpu.matmul %0, %1, %cst {dimension_numbers = #tpu.dot_dimension_numbers<[1], [0], [0], [1], [0, 0, 1, 1], [], []>} : vector<32x216xbf16>, vector<216x128xbf16>, vector<32x128xf32> -> vector<32x128xf32>
    %c0_3 = arith.constant 0 : index
    %c0_4 = arith.constant 0 : index
    %3 = vector.load %arg3[%c0_3, %c0_4] : memref<1x128xf32, #tpu.memory_space<vmem>>, vector<1x128xf32>
    %4 = vector.broadcast %3 : vector<1x128xf32> to vector<32x128xf32>
    %5 = arith.addf %2, %4 : vector<32x128xf32>
    %cst_5 = arith.constant 0.000000e+00 : f32
    %6 = vector.broadcast %cst_5 : f32 to vector<32x128xf32>
    %7 = arith.maximumf %5, %6 : vector<32x128xf32>
    %c0_6 = arith.constant 0 : index
    %c0_7 = arith.constant 0 : index
    %8 = vector.load %arg5[%c0_6, %c0_7] : memref<32x128xf32, #tpu.memory_space<vmem>>, vector<32x128xf32>
    tpu.vector_store %arg5[%c0_6, %c0_7], %7 {strides = array<i32>} : memref<32x128xf32, #tpu.memory_space<vmem>>, vector<32x128xf32>,
    %9 = arith.truncf %7 : vector<32x128xf32> to vector<32x128xbf16>
    %c0_8 = arith.constant 0 : index
    %c0_9 = arith.constant 0 : index
    %10 = vector.load %arg4[%c0_8, %c0_9] : memref<128x8xbf16, #tpu.memory_space<vmem>>, vector<128x8xbf16>
    %cst_10 = arith.constant dense<0.000000e+00> : vector<32x8xf32>
    %11 = tpu.matmul %9, %10, %cst_10 {dimension_numbers = #tpu.dot_dimension_numbers<[1], [0], [0], [1], [0, 0, 1, 1], [], []>} : vector<32x128xbf16>, vector<128x8xbf16>, vector<32x8xf32> -> vector<32x8xf32>
    %12 = vector.extract_strided_slice %11 {offsets = [0, 0], sizes = [16, 8], strides = [1, 1]} : vector<32x8xf32> to vector<16x8xf32>
    %cst_11 = arith.constant dense<0.000000e+00> : vector<8xf32>
    %13 = vector.multi_reduction <add>, %12, %cst_11 [0] : vector<16x8xf32> to vector<8xf32>
    %14 = vector.shape_cast %13 : vector<8xf32> to vector<1x8xf32>
    %cst_12 = arith.constant 3.906250e-03 : f32
    %15 = vector.broadcast %cst_12 : f32 to vector<1x8xf32>
    %16 = arith.mulf %14, %15 : vector<1x8xf32>
    %c0_13 = arith.constant 0 : index
    %c0_14 = arith.constant 0 : index
    %17 = vector.load %arg6[%c0_13, %c0_14] : memref<2x8xf32, #tpu.memory_space<vmem>>, vector<1x8xf32>
    tpu.vector_store %arg6[%c0_13, %c0_14], %16 {strides = array<i32>} : memref<2x8xf32, #tpu.memory_space<vmem>>, vector<1x8xf32>,
    %18 = vector.extract_strided_slice %11 {offsets = [16, 0], sizes = [16, 8], strides = [1, 1]} : vector<32x8xf32> to vector<16x8xf32>
    %cst_15 = arith.constant dense<0.000000e+00> : vector<8xf32>
    %19 = vector.multi_reduction <add>, %18, %cst_15 [0] : vector<16x8xf32> to vector<8xf32>
    %20 = vector.shape_cast %19 : vector<8xf32> to vector<1x8xf32>
    %cst_16 = arith.constant 3.906250e-03 : f32
    %21 = vector.broadcast %cst_16 : f32 to vector<1x8xf32>
    %22 = arith.mulf %20, %21 : vector<1x8xf32>
    %c1 = arith.constant 1 : index
    %c0_17 = arith.constant 0 : index
    %23 = vector.load %arg6[%c1, %c0_17] : memref<2x8xf32, #tpu.memory_space<vmem>>, vector<1x8xf32>
    tpu.vector_store %arg6[%c1, %c0_17], %22 {strides = array<i32>} : memref<2x8xf32, #tpu.memory_space<vmem>>, vector<1x8xf32>,
    return
  }
  func.func @transform_0(%arg0: i32) -> (i32, i32) {
    %c0_i32 = arith.constant 0 : i32
    %c0_i32_0 = arith.constant 0 : i32
    %c0_i32_1 = arith.constant 0 : i32
    return %c0_i32, %c0_i32_0 : i32, i32
  }
  func.func @transform_1(%arg0: i32) -> (i32, i32) {
    %c0_i32 = arith.constant 0 : i32
    %c0_i32_0 = arith.constant 0 : i32
    %c0_i32_1 = arith.constant 0 : i32
    return %c0_i32, %c0_i32_0 : i32, i32
  }
  func.func @transform_2(%arg0: i32) -> (i32, i32) {
    %c0_i32 = arith.constant 0 : i32
    %c0_i32_0 = arith.constant 0 : i32
    %c0_i32_1 = arith.constant 0 : i32
    return %c0_i32, %c0_i32_0 : i32, i32
  }
  func.func @transform_3(%arg0: i32) -> (i32, i32) {
    %c0_i32 = arith.constant 0 : i32
    %c0_i32_0 = arith.constant 0 : i32
    %c0_i32_1 = arith.constant 0 : i32
    return %c0_i32, %c0_i32_0 : i32, i32
  }
  func.func @transform_4(%arg0: i32) -> (i32, i32) {
    %c0_i32 = arith.constant 0 : i32
    %c0_i32_0 = arith.constant 0 : i32
    %c0_i32_1 = arith.constant 0 : i32
    return %c0_i32, %c0_i32_0 : i32, i32
  }
  func.func @transform_5(%arg0: i32) -> (i32, i32) {
    %c0_i32 = arith.constant 0 : i32
    %c0_i32_0 = arith.constant 0 : i32
    %c0_i32_1 = arith.constant 0 : i32
    return %c0_i32, %c0_i32_0 : i32, i32
  }
}

</mosaic_0001>

<bundles_post_ra>
// kernel: _forward_impl.1
= control target key start
LH: loop header
LB: loop body
LE: loop exit
PB: predicated region body
PF: predicated region fallthrough
CT: control target
= control target key end

     0   :  { %v494_v1 = vmov 0   ;;  %vm158_vm0 = vcmask 719872   ;;  %s624_s0 = inlined_call_operand.vmem [shape: bf16[32,216], index: 0, kind: input, shape index: {}]   ;;  %s625_s1 = inlined_call_operand.vmem [shape: bf16[216,128], index: 1, kind: input, shape index: {}]   ;;  %s626_s2 = inlined_call_operand.vmem [shape: f32[1,128], index: 2, kind: input, shape index: {}]   ;;  %s627_s3 = inlined_call_operand.vmem [shape: bf16[128,8], index: 3, kind: input, shape index: {}]   ;;  %s628_s4 = inlined_call_operand.vmem [shape: f32[32,128], index: 4, kind: output, shape index: {0}]   ;;  %s629_s5 = inlined_call_operand.hbm [shape: f32[2,8], index: 5, kind: output, shape index: {1}]  }
   0x1   :  { %v444_v0 = vld [vmem:[%s625_s1 + $0x38] sm:$0xff]   ;;  %169 = vmatprep.subr.bf16.mxu0 %v494_v1  ;;  %v445_v2 = vld [vmem:[%s625_s1 + $0x30] sm:$0xff]   ;;  %v446_v3 = vld [vmem:[%s625_s1 + $0x28] sm:$0xff]  }
   0x2   :  { %170 = vmatpush1.bf16.msra.mxu0 %v444_v0  ;;  %v447_v4 = vld [vmem:[%s625_s1 + $0x20] sm:$0xff]   ;;  %v448_v5 = vld [vmem:[%s625_s1 + $0x18] sm:$0xff]   ;;  %v449_v7 = vld [vmem:[%s625_s1 + $0x10] sm:$0xff]  }
   0x3   :  { %171 = vmatprep.subr.bf16.mxu0 %v494_v1  ;;  %v460_v6 = vld [vmem:[%s624_s0 + $0x4] ss:$8 sps:$4 sm:$0xff]   ;;  %v464_v8 = vld [vmem:[%s627_s3 + $0x38] sm:$0xff]   ;;  %v465_v9 = vld [vmem:[%s627_s3 + $0x30] sm:$0xff]  }
   0x4   :  { %402 = vmatprep.mubr.msk.bf16.mxu0 %vm158_vm0, %v460_v6  ;;  %422 = vmatprep.subr.bf16.mxu1 %v464_v8  ;;  %v450_v10 = vld [vmem:[%s625_s1 + $0x8] sm:$0xff]  }
   0x5   :  { %423 = vmatpush3.bf16.msra.mxu1 %v464_v8  ;;  %v466_v11 = vld [vmem:[%s627_s3 + $0x28] sm:$0xff]  }
   0x6   :  { %172 = vmatpush1.bf16.msra.mxu0 %v445_v2  ;;  %424 = vmatprep.subr.bf16.mxu1 %v465_v9 }
   0x7   :  { %173 = vmatprep.subr.bf16.mxu0 %v494_v1 }
   0xa   :  { %174 = vmatpush1.bf16.msra.mxu0 %v446_v3 }
   0xb   :  { %175 = vmatprep.subr.bf16.mxu0 %v494_v1 }
   0xe   :  { %176 = vmatpush1.bf16.msra.mxu0 %v447_v4 }
   0xf   :  { %177 = vmatprep.subr.bf16.mxu0 %v494_v1 }
  0x12   :  { %178 = vmatpush1.bf16.msra.mxu0 %v448_v5 }
  0x13   :  { %179 = vmatprep.subr.bf16.mxu0 %v494_v1 }
  0x16   :  { %180 = vmatpush1.bf16.msra.mxu0 %v449_v7 }
  0x17   :  { %181 = vmatprep.subr.bf16.mxu0 %v494_v1 }
  0x18   :  { %11 = vsyncpa [#allocation3], 0  ;;  %425 = vmatpush3.bf16.msra.mxu1 %v465_v9  ;;  %v467_v12 = vld [vmem:[%s627_s3 + $0x20] sm:$0xff]   ;;  %v452_v14 = vld [vmem:[%s625_s1 + $0x68] ss:$0 sps:$4 sm:$0xff]   ;;  %vm165_vm1 = vcmask 1043456  }
  0x19   :  { %426 = vmatprep.subr.bf16.mxu1 %v466_v11  ;;  %v451_v13 = vld [vmem:[%s625_s1] sm:$0xff]   ;;  %v167_v15 = vsel %vm165_vm1, %v452_v14, 0  ;;  %v454_v17 = vld [vmem:[%s625_s1 + $0x58] sm:$0xff]   ;;  %v455_v18 = vld [vmem:[%s625_s1 + $0x50] sm:$0xff]   ;;  %vm341_vm2 = vcmask 64512   ;;  %vm352_vm3 = vcmask 57344  }
  0x1a   :  { %182 = vmatpush1.bf16.msra.mxu0 %v450_v10  ;;  %v453_v16 = vld [vmem:[%s625_s1 + $0x60] sm:$0xff]   ;;  %v456_v19 = vld [vmem:[%s625_s1 + $0x48] sm:$0xff]   ;;  %v461_v22 = vld [vmem:[%s624_s0 + $0x14] ss:$8 sps:$4 sm:$0xff]  }
  0x1b   :  { %183 = vmatprep.subr.bf16.mxu0 %v494_v1  ;;  %v457_v20 = vld [vmem:[%s625_s1 + $0x40] sm:$0xff]   ;;  %v463_v23 = vld [vmem:[%s624_s0 + $0x10] ss:$8 sps:$4 sm:$0xff]   ;;  %v470_v26 = vld [vmem:[%s627_s3 + $0x8] sm:$0xff]  }
  0x1c   :  { %427 = vmatpush3.bf16.msra.mxu1 %v466_v11  ;;  %v458_v21 = vld [vmem:[%s624_s0] ss:$8 sps:$4 sm:$0xff]   ;;  %v468_v24 = vld [vmem:[%s627_s3 + $0x18] sm:$0xff]   ;;  %v469_v25 = vld [vmem:[%s627_s3 + $0x10] sm:$0xff]  }
  0x1d   :  { %428 = vmatprep.subr.bf16.mxu1 %v467_v12  ;;  %v471_v27 = vld [vmem:[%s627_s3] sm:$0xff]  }
  0x1e   :  { %184 = vmatpush1.bf16.msra.mxu0 %v451_v13  ;;  %v383_v28 = vld [vmem:[%s626_s2] ss:$0 sm:$0xff] }
  0x1f   :  { %189 = vmatprep.subr.bf16.mxu0 %v494_v1 }
  0x20   :  { %429 = vmatpush3.bf16.msra.mxu1 %v467_v12 }
  0x21   :  { %430 = vmatprep.subr.bf16.mxu1 %v468_v24 }
  0x22   :  { %190 = vmatpush2.bf16.msra.mxu0 %v167_v15 }
  0x23   :  { %191 = vmatprep.subr.bf16.mxu0 %v494_v1 }
  0x24   :  { %431 = vmatpush3.bf16.msra.mxu1 %v468_v24 }
  0x25   :  { %432 = vmatprep.subr.bf16.mxu1 %v469_v25 }
  0x26   :  { %192 = vmatpush2.bf16.msra.mxu0 %v453_v16 }
  0x27   :  { %193 = vmatprep.subr.bf16.mxu0 %v494_v1 }
  0x28   :  { %433 = vmatpush3.bf16.msra.mxu1 %v469_v25 }
  0x29   :  { %434 = vmatprep.subr.bf16.mxu1 %v470_v26 }
  0x2a   :  { %194 = vmatpush2.bf16.msra.mxu0 %v454_v17 }
  0x2b   :  { %195 = vmatprep.subr.bf16.mxu0 %v494_v1 }
  0x2c   :  { %435 = vmatpush3.bf16.msra.mxu1 %v470_v26 }
  0x2d   :  { %436 = vmatprep.subr.bf16.mxu1 %v471_v27 }
  0x2e   :  { %196 = vmatpush2.bf16.msra.mxu0 %v455_v18 }
  0x2f   :  { %197 = vmatprep.subr.bf16.mxu0 %v494_v1 }
  0x30   :  { %437 = vmatpush3.bf16.msra.mxu1 %v471_v27 }
  0x32   :  { %198 = vmatpush2.bf16.msra.mxu0 %v456_v19 }
  0x33   :  { %199 = vmatprep.subr.bf16.mxu0 %v494_v1 }
  0x36   :  { %200 = vmatpush2.bf16.msra.mxu0 %v457_v20 }
  0x39   :  { %202 = vmatmul.mubr.bf16.vlgmr.msra.gmra.mxu0 %v458_v21 }
  0x3a   :  { %403 = vmatprep.mubr.msk.bf16.mxu0 %vm158_vm0, %v461_v22 }
  0x41   :  { %210 = vmatmul.mubr.bf16.gmra.mxu0 %v463_v23 }
  0xf9   :  { %v203_v29 = vpop.f32.mrf.mxu0 }
  0xfa   :  { %v204_v30 = vadd.f32 %v383_v28, %v203_v29 }
  0xfb   :  { %v205_v31 = vpop.f32.mrf.mxu0 }
  0xfc   :  { %v218_v32 = vmax.f32 %v204_v30, 0.0 }
  0xfd   :  { %v206_v33 = vpop.f32.mrf.mxu0 }
  0xfe   :  { %222 = vst [vmem:[%s628_s4] sm:$0xff] %v218_v32  ;;  %v207_v34 = vadd.f32 %v383_v28, %v206_v33 }
  0xff   :  { %v208_v35 = vpop.f32.mrf.mxu0 }
 0x100   :  { %v219_v36 = vmax.f32 %v207_v34, 0.0 }
 0x101   :  { %v211_v37 = vpop.f32.mrf.mxu0 }
 0x102   :  { %223 = vst [vmem:[%s628_s4 + $0x8] sm:$0xff] %v219_v36  ;;  %v212_v38 = vadd.f32 %v383_v28, %v211_v37  ;;  %v226_v39 = vpack.c.bf16 %v219_v36, %v218_v32 }
 0x103   :  { %v213_v40 = vpop.f32.mrf.mxu0 }
 0x104   :  { %v220_v41 = vmax.f32 %v212_v38, 0.0  ;;  %438 = vmatprep.mubr.bf16.mxu1 %v226_v39 }
 0x105   :  { %v214_v42 = vpop.f32.mrf.mxu0 }
 0x106   :  { %224 = vst [vmem:[%s628_s4 + $0x10] sm:$0xff] %v220_v41  ;;  %v215_v43 = vadd.f32 %v383_v28, %v214_v42 }
 0x107   :  { %v216_v44 = vpop.f32.mrf.mxu0 }
 0x108   :  { %v221_v45 = vmax.f32 %v215_v43, 0.0 }
 0x10a   :  { %225 = vst [vmem:[%s628_s4 + $0x18] sm:$0xff] %v221_v45  ;;  %v227_v46 = vpack.c.bf16 %v221_v45, %v220_v41  ;;  %s495_s4 = smov [#allocation2]  }
 0x10b   :  { %s373_s26 = sshll.u32 %s495_s4, 4  ;;  %s374_s26 = int_to_ptr.vmem [resolvable:$true] %s373_s26 }
 0x10c   :  { %439 = vmatmul.mubr.bf16.vlgmr.msra.gmra.mxu1 %v227_v46  ;;  %s472_s27 = scalar_lea.vmem %s374_s26, 32  ;;  %p477_p1 = scmp.lt.s32.totalorder %s374_s26, %s374_s26 }
 0x10d   :  { %p473_p0 = scmp.ne.s32.totalorder %s374_s26, %s472_s27  ;;  %p478_p2 = scmp.lt.s32.totalorder %s472_s27, %s472_s27 }
 0x10f   :  { %p479_p3 = por %p478_p2, %p477_p1 }
 0x111   :  { %p480_p4 = pnand %p479_p3, %p473_p0 }
 0x1cc   :  { %v440_v47 = vpop.f32.mrf.mxu1 }
 0x1cd   :  { %v354_v50 = vsel %vm341_vm2, %v440_v47, 0.0 }
 0x1ce   :  { %v326_v48 = vpop.f32.mrf.mxu1 }
 0x1cf   :  { %v342_v54 = vsel %vm341_vm2, %v326_v48, 0.0 }
 0x1d0   :  { %v441_v49 = vpop.f32.mrf.mxu1 }
 0x1d1   :  { %v355_v51 = vsel %vm341_vm2, %v441_v49, 0.0 }
 0x1d2   :  { %v356_v52 = vadd.f32 %v355_v51, %v354_v50  ;;  %v329_v53 = vpop.f32.mrf.mxu1 }
 0x1d3   :  { %v343_v55 = vsel %vm341_vm2, %v329_v53, 0.0 }
 0x1d4   :  { %v357_v56 = vrot.slane %v356_v52, 4  ;;  %v344_v57 = vadd.f32 %v343_v55, %v342_v54 }
 0x1d6   :  { %v358_v58 = vadd.f32 %v357_v56, %v356_v52  ;;  %v345_v59 = vrot.slane %v344_v57, 4 }
 0x1d8   :  { %v359_v60 = vrot.slane %v358_v58, 2  ;;  %v346_v61 = vadd.f32 %v345_v59, %v344_v57 }
 0x1da   :  { %v360_v62 = vadd.f32 %v359_v60, %v358_v58  ;;  %v347_v63 = vrot.slane %v346_v61, 2 }
 0x1dc   :  { %v361_v0 = vrot.slane %v360_v62, 1  ;;  %v348_v1 = vadd.f32 %v347_v63, %v346_v61 }
 0x1de   :  { %v349_v2 = vrot.slane %v348_v1, 1  ;;  %v362_v3 = vadd.f32 %v361_v0, %v360_v62 }
 0x1e0   :  { %v350_v4 = vadd.f32 %v349_v2, %v348_v1  ;;  %v363_v5 = vmul.f32 0.00390625, %v362_v3 }
 0x1e2   :  { %v351_v6 = vmul.f32 0.00390625, %v350_v4  ;;  %364 = vst.msk [vmem:[#allocation2 + $0x1] sm:$0x1] %vm352_vm3, %v363_v5 }
 0x1e4   :  { %353 = vst.msk [vmem:[#allocation2] sm:$0x1] %vm352_vm3, %v351_v6 }
 0x1e5   :  { %483 = shalt.err (!%p480_p4)
}
 0x1e6   :  { %376 = dma.vmem_to_hbm [thread:$0]  %s374_s26, 32, %s629_s5, [#allocation3]  }
 0x1e7   :  { %492 = dma.done.wait [#allocation3], 32  }
 0x1e8   :  { %493 = vsyncadd [#allocation3], 4294967264 }
 0x1e9   :  { %382 = vsyncpa [#allocation3], 1 }

</bundles_post_ra>
